<compile_context>
chip_gen: v7x
topology: tpu7x:2x2x1
jax: 0.10.0
libtpu: 0.0.40
codegen_flags: <defaults>
</compile_context>

<pallas_src>
import jax
import jax.numpy as jnp
from jax.experimental import pallas as pl
from jax.experimental.pallas import tpu as pltpu


def _group_max_kernel(x_ref, o_ref):
    # x_ref: (1, Rt, dim_rep, HWt)   o_ref: (1, Rt, HWt)
    o_ref[...] = jnp.max(x_ref[...], axis=2)


def _choose_tiles(num_rep, dim_rep, hw_padded, itemsize):
    """Pick (Rt, HWt) so the double-buffered footprint fits every generation.

    Per-buffer-set bytes = Rt * (padded_dim_rep + 1) * HWt * itemsize, where
    padded_dim_rep accounts for sublane padding of the dim_rep axis in VMEM
    (8 rows for 4-byte dtypes, 16 for 2-byte, 32 for 1-byte).  Pallas
    double-buffers, so the budget below is ~half the safe VMEM target.
    """
    sublane = {4: 8, 2: 16, 1: 32}.get(itemsize, 8)
    padded_dim = ((dim_rep + sublane - 1) // sublane) * sublane
    budget = 6 * 1024 * 1024  # bytes per buffer set -> ~12 MiB double-buffered

    def max_rt(hwt):
        return budget // ((padded_dim + 1) * hwt * itemsize)

    # Lane tile: multiple of 128, prefer the 512-2048 sweet spot, never exceed
    # the (already 128-padded) hw extent.
    hw_t = min(hw_padded, 2048)
    while hw_t > 128 and max_rt(hw_t) < min(num_rep, 8):
        hw_t = max(128, hw_t // 2)

    if num_rep <= 8:
        rt = num_rep                      # full dim -> always layout-legal
    else:
        rt = min(num_rep, max(1, int(max_rt(hw_t))))
        rt = (rt // 8) * 8 if rt >= 8 else 8   # keep sublane-aligned blocks
    return rt, hw_t


def group_pooling(x, dim_rep, num_rep, pool_type="max"):
    N, C, H, W = x.shape
    assert C == num_rep * dim_rep, "channels must equal num_rep * dim_rep"
    if pool_type != "max":
        # TODO(synk): the PyTorch 'avg' branch is buggy (AdaptiveAvgPool3d gets
        # an invalid second arg and would raise), so only 'max' is implemented.
        raise NotImplementedError("only 'max' pooling is implemented")

    itemsize = jnp.dtype(x.dtype).itemsize
    hw = H * W
    hw_padded = ((hw + 127) // 128) * 128

    xr = x.reshape(N, num_rep, dim_rep, hw)
    if hw_padded != hw:
        # Pad the lane axis so output stores are lane-dense (no masked vst).
        if jnp.issubdtype(x.dtype, jnp.floating):
            pad_val = jnp.finfo(x.dtype).min
        else:
            pad_val = jnp.iinfo(x.dtype).min
        xr = jnp.pad(
            xr,
            ((0, 0), (0, 0), (0, 0), (0, hw_padded - hw)),
            constant_values=pad_val,
        )

    rt, hw_t = _choose_tiles(num_rep, dim_rep, hw_padded, itemsize)
    grid = (N, pl.cdiv(num_rep, rt), pl.cdiv(hw_padded, hw_t))

    cost = pl.CostEstimate(
        flops=int(N * num_rep * max(dim_rep - 1, 0) * hw_padded),
        transcendentals=0,
        bytes_accessed=int(
            (N * num_rep * dim_rep * hw_padded + N * num_rep * hw_padded) * itemsize
        ),
    )

    out = pl.pallas_call(
        _group_max_kernel,
        out_shape=jax.ShapeDtypeStruct((N, num_rep, hw_padded), x.dtype),
        grid=grid,
        in_specs=[
            pl.BlockSpec((1, rt, dim_rep, hw_t), lambda n, r, w: (n, r, 0, w)),
        ],
        out_specs=pl.BlockSpec((1, rt, hw_t), lambda n, r, w: (n, r, w)),
        compiler_params=pltpu.CompilerParams(
            dimension_semantics=("parallel", "parallel", "parallel"),
            vmem_limit_bytes=32 * 1024 * 1024,
        ),
        cost_estimate=cost,
    )(xr)

    if hw_padded != hw:
        out = out[:, :, :hw]
    return out.reshape(N, num_rep, H, W)


if __name__ == "__main__":
    # Small shapes consistent with the module: batch=2, num_rep=2, dim_rep=4,
    # so C = 8 channels, spatial 16x16.
    N, num_rep, dim_rep, H, W = 2, 2, 4, 16, 16
    C = num_rep * dim_rep

    key = jax.random.PRNGKey(0)
    x = jax.random.normal(key, (N, C, H, W), dtype=jnp.float32)

    y = group_pooling(x, dim_rep=dim_rep, num_rep=num_rep, pool_type="max")
    y = jax.block_until_ready(y)

    # Reference check (plain JAX, mirrors the PyTorch forward exactly).
    y_ref = jnp.max(x.reshape(N, num_rep, dim_rep, H, W), axis=2)
    assert y.shape == (N, num_rep, H, W)
    assert jnp.allclose(y, y_ref), "mismatch vs reference"

    print("KERNEL_OK")
</pallas_src>

<mosaic_0001>
module attributes {stable_mosaic.version = 11 : i64} {
  func.func @_group_max_kernel(%arg0: i32, %arg1: i32, %arg2: i32, %arg3: memref<1x2x4x256xf32, #tpu.memory_space<vmem>>, %arg4: memref<1x2x256xf32, #tpu.memory_space<vmem>>) attributes {dimension_semantics = [#tpu.dimension_semantics<parallel>, #tpu.dimension_semantics<parallel>, #tpu.dimension_semantics<parallel>], iteration_bounds = array<i64: 2, 1, 1>, scalar_prefetch = 0 : i64, scratch_operands = 0 : i64, tpu.core_type = #tpu.core_type<tc>, window_params = [{transform_indices = @transform_0, window_bounds = array<i64: 1, 2, 4, 256>}, {transform_indices = @transform_1, window_bounds = array<i64: 1, 2, 256>}]} {
    %c0 = arith.constant 0 : index
    %c0_0 = arith.constant 0 : index
    %c0_1 = arith.constant 0 : index
    %c0_2 = arith.constant 0 : index
    %0 = vector.load %arg3[%c0, %c0_0, %c0_1, %c0_2] : memref<1x2x4x256xf32, #tpu.memory_space<vmem>>, vector<1x2x4x256xf32>
    %cst = arith.constant dense<0xFF800000> : vector<1x2x256xf32>
    %1 = vector.multi_reduction <maximumf>, %0, %cst [2] : vector<1x2x4x256xf32> to vector<1x2x256xf32>
    %c0_3 = arith.constant 0 : index
    %c0_4 = arith.constant 0 : index
    %c0_5 = arith.constant 0 : index
    %2 = vector.load %arg4[%c0_3, %c0_4, %c0_5] : memref<1x2x256xf32, #tpu.memory_space<vmem>>, vector<1x2x256xf32>
    tpu.vector_store %arg4[%c0_3, %c0_4, %c0_5], %1 {strides = array<i32>} : memref<1x2x256xf32, #tpu.memory_space<vmem>>, vector<1x2x256xf32>,
    return
  }
  func.func @transform_0(%arg0: i32, %arg1: i32, %arg2: i32) -> (i32, i32, i32, i32) {
    %c0_i32 = arith.constant 0 : i32
    %c0_i32_0 = arith.constant 0 : i32
    return %arg0, %arg1, %c0_i32, %arg2 : i32, i32, i32, i32
  }
  func.func @transform_1(%arg0: i32, %arg1: i32, %arg2: i32) -> (i32, i32, i32) {
    %c0_i32 = arith.constant 0 : i32
    return %arg0, %arg1, %arg2 : i32, i32, i32
  }
}

</mosaic_0001>

<bundles_post_ra>
// kernel: tpu_custom_call.1
= control target key start
LH: loop header
LB: loop body
LE: loop exit
PB: predicated region body
PF: predicated region fallthrough
CT: control target
= control target key end

     0   :  { %6 = vsyncpa [#allocation3], 0  ;;  %s739_s0 = inlined_call_operand.hbm [shape: f32[2,2,4,256], index: 0, kind: input, shape index: {}]   ;;  %s740_s1 = inlined_call_operand.hbm [shape: f32[2,2,256], index: 1, kind: output, shape index: {}]  }
   0x1   :  { %8 = vsyncpa [#allocation3 + $0x1], 0 }
   0x2   :  { %9 = vsyncpa [#allocation4], 0 }
   0x3   :  { %11 = vsyncpa [#allocation4 + $0x1], 0  ;;  %s565_s6 = smov 0   ;;  %s567_s7 = smov 0  }
   0x4   :  { %s569_s8 = smov 0   ;;  %s571_s9 = smov 0  }
   0x5   :  { %s573_s10 = smov 0   ;;  %s575_s11 = smov 0  }
   0x6 LB: > { %s352_s12 = sadd.s32 4294967295, %s548_s11   ;;  %s353_s13 = sadd.s32 4294967294, %s548_s11   ;;  %s548_s11 = sphi %s575_s11, %s17_s11   ;;  %s544_s10 = sphi %s573_s10, %s755_s10   ;;  %s540_s9 = sphi %s571_s9, %s754_s9   ;;  %s536_s8 = sphi %s569_s8, %s753_s8   ;;  %s532_s7 = sphi %s567_s7, %s752_s7   ;;  %s528_s6 = sphi %s565_s6, %s751_s6  }
   0x7   : > { %s36_s14 = sadd.s32 1, %s544_s10  ;;  %s47_s15 = sadd.s32 1, %s536_s8 }
   0x8   : > { %p38_p0 = scmp.ge.s32.totalorder %s36_s14, 2  ;;  %p54_p1 = scmp.ne.s32.totalorder %s536_s8, %s532_s7 }
   0x9   : > { %p55_p2 = scmp.eq.s32.totalorder %s548_s11, 0  ;;  %p60_p3 = scmp.ne.s32.totalorder %s532_s7, %s528_s6 }
   0xa   : > { %s757_s14 = smov (%p38_p0, %s36_s14), 0  ;;  %p61_p5 = scmp.eq.s32.totalorder %s352_s12, 0 }
   0xb   : > { %p606_p4 = por %p55_p2, %p54_p1  ;;  %s40_s17 = ssub.s32 %s544_s10, %s757_s14 }
   0xc   : > { %p88_p6 = scmp.eq.s32.totalorder %s352_s12, 1  ;;  %p45_p7 = scmp.eq.s32.totalorder %s40_s17, 0 }
   0xd   : > { %p612_p8 = por %p61_p5, %p60_p3  ;;  %p94_p10 = scmp.eq.s32.totalorder %s353_s13, 1 }
   0xe   : > { %p616_p9 = por %p88_p6, %p54_p1  ;;  %p381_p13 = scmp.lt.s32.totalorder %s548_s11, 2 }
   0xf   : > { %s621_s20 = scalar_select %p45_p7, %s536_s8, %s47_s15  }
  0x10   : > { %s744_s19 = scalar_select %p616_p9, 1, 0 }
  0x11   : > { %p623_p11 = por %p94_p10, %p60_p3  ;;  %s114_s22 = sand.u32 1, %s536_s8  }
  0x12   : > { %s356_s23 = sshll.u32 %s114_s22, 4  ;;  %s367_s24 = sshll.u32 %s544_s10, 8 }
  0x13   : > { %s745_s21 = scalar_select %p623_p11, 1, 0 }
  0x14   : > { %s634_s27 = scalar_lea.hbm %s739_s0, %s367_s24  ;;  %s118_s28 = scalar_lea.vmem [#allocation2], %s356_s23 }
  0x15   : > { %s130_s29 = sshll.u32 %s118_s28, 4  ;;  %p640_p0 = pnand %p381_p13, %p606_p4  ;;  %s636_s29 = int_to_ptr.vmem [resolvable:$true] %s130_s29 }
  0x16   : > { %s645_s2 = scalar_lea.sflag [#allocation3], %s114_s22  ;;  %s436_s3 = scalar_lea.hbm %s634_s27, 256 }
  0x17   : > { %p437_p2 = scmp.ne.s32.totalorder %s634_s27, %s436_s3  ;;  %p438_p3 = pneg %p640_p0 }
  0x18   : > { %s441_s12 = scalar_lea.hbm %s739_s0, 512  ;;  %p442_p4 = scmp.lt.u32.totalorder %s634_s27, %s739_s0 }
  0x19   : > { %p439_p5 = pnand %p438_p3, %p437_p2  ;;  %p443_p7 = scmp.lt.u32.totalorder %s441_s12, %s436_s3 }
  0x1a   : > { %p445_p13 = scmp.lt.u32.totalorder %s436_s3, %s634_s27 }
  0x1b   : > { %p440_p6 = pneg %p439_p5  ;;  %p444_p10 = por %p443_p7, %p442_p4 }
  0x1d   : > { %p446_p12 = por %p445_p13, %p444_p10 }
  0x1f   : > { %p447_p1 = pnand %p446_p12, %p440_p6 }
  0x21   : > { %450 = shalt.err (!%p447_p1)
}
  0x22   : > { %s451_s16 = scalar_lea.vmem %s636_s29, 256  ;;  %s550_s17 = smov [#allocation2]  }
  0x23   : > { %p452_p2 = scmp.ne.s32.totalorder %s636_s29, %s451_s16  ;;  %s456_s22 = sshll.u32 %s550_s17, 4  ;;  %s457_s22 = int_to_ptr.vmem [resolvable:$false] %s456_s22 }
  0x24   : > { %s458_s23 = scalar_lea.vmem %s457_s22, 512  ;;  %p459_p9 = scmp.lt.s32.totalorder %s636_s29, %s457_s22 }
  0x25   : > { %p454_p5 = pnand %p452_p2, %p438_p3  ;;  %p460_p4 = scmp.lt.s32.totalorder %s458_s23, %s451_s16 }
  0x27   : > { %p455_p11 = pneg %p454_p5  ;;  %p461_p7 = por %p460_p4, %p459_p9 }
  0x29   : > { %p462_p10 = pnand %p461_p7, %p455_p11 }
  0x2b   : > { %465 = shalt.err (!%p462_p10)
}
  0x2c   : > { %s551_s24 = smov 128   ;;  %s552_s25 = smov 8  }
  0x2d   : > { %376 = dma.hbm_to_vmem [thread:$0]  (!%p640_p0), %s634_s27, 256, %s636_s29, %s645_s2, %s551_s24, %s551_s24, %s552_s25  }
  0x2e   : > { %p138_p12 = scmp.lt.s32.totalorder %s548_s11, 3  ;;  %p747_p1 = scmp.ge.s32.totalorder %s548_s11, 1 }
  0x30   : > { %p139_p3 = pnand %p747_p1, %p138_p12 }
  0x31   : > { %s677_s26 = sand.u32 (!%p139_p3), 1, %s532_s7  }
  0x32   : > { %142 = sbr.rel (%p139_p3) target bundleno = 98 (0x62), region = 24  ;;  %s360_s28 = sshll.u32 (!%p139_p3), %s677_s26, 4 }
  0x33   : > { %s145_s3 = scalar_lea.sflag (!%p139_p3), [#allocation3], %s677_s26  ;;  %s148_s4 = scalar_lea.vmem (!%p139_p3), [#allocation2], %s360_s28 }
  0x39   : > { %519 = dma.done.wait (%p612_p8), %s145_s3, 256  }
  0x3a   : > { %521 = vsyncadd (%p612_p8), %s145_s3, 4294967040  ;;  %vm178_vm0 = vcmask 1043456   ;;  %v170_v0 = vld [vmem:[%s148_s4] sm:$0xff]  ;;  %v171_v1 = vld [vmem:[%s148_s4 + $0x8] sm:$0xff]  ;;  %v553_v14 = vmov 1983009808   ;;  %v215_v16 = vlaneseq }
  0x3b   : > { %v174_v2 = vcombine.high %v170_v0, %v170_v0  ;;  %v175_v3 = vcombine.high %v171_v1, %v171_v1  ;;  %v179_v4 = vsel %vm178_vm0, %v170_v0, -inf  ;;  %v193_v5 = vsel %vm178_vm0, %v171_v1, -inf  ;;  %s361_s18 = sshll.u32 %s677_s26, 2  ;;  %s368_s30 = sshll.u32 %s540_s9, 6 }
  0x3c   : > { %v180_v6 = vrot.slane %v179_v4, 4  ;;  %v194_v7 = vrot.slane %v193_v5, 4  ;;  %v213_v15 = vunpack.c.l.s4 %v553_v14  ;;  %v216_v26 = vshrl.u32 %v215_v16, 7  ;;  %s166_s27 = scalar_lea.vmem [#allocation5], %s361_s18  ;;  %s692_s12 = scalar_lea.hbm %s740_s1, %s368_s30 }
  0x3d   : > { %v186_v8 = vsel %vm178_vm0, %v174_v2, -inf  ;;  %v200_v9 = vsel %vm178_vm0, %v175_v3, -inf  ;;  %vm232_vm1 = vcmask 1041409   ;;  %vm234_vm2 = vcmask 1043459   ;;  %s261_s29 = sshll.u32 %s166_s27, 4  ;;  %s243_s13 = scalar_lea.sflag [#allocation4], %s677_s26  ;;  %s687_s29 = int_to_ptr.vmem [resolvable:$true] %s261_s29 }
  0x3e   : > { %v181_v10 = vmax.f32 %v179_v4, %v180_v6  ;;  %v187_v11 = vrot.slane %v186_v8, 4  ;;  %v195_v12 = vmax.f32 %v193_v5, %v194_v7  ;;  %v201_v13 = vrot.slane %v200_v9, 4  ;;  %s466_s15 = scalar_lea.vmem %s687_s29, 64  ;;  %p748_p9 = scmp.ne.s32.totalorder %s744_s19, 0 }
  0x3f   : > { %v214_v25 = vunpack.c.0.s8 %v213_v15  ;;  %vm236_vm3 = vcmask 1045509   ;;  %vm238_vm4 = vcmask 1047559   ;;  %p467_p8 = scmp.ne.s32.totalorder %s687_s29, %s466_s15  ;;  %s554_s9 = smov [#allocation5]  }
  0x40   : > { %v182_v17 = vrot.slane %v181_v10, 2  ;;  %v188_v18 = vmax.f32 %v186_v8, %v187_v11  ;;  %v196_v19 = vrot.slane %v195_v12, 2  ;;  %v202_v20 = vmax.f32 %v200_v9, %v201_v13  ;;  %s470_s16 = sshll.u32 %s554_s9, 4  ;;  %s471_s16 = int_to_ptr.vmem [resolvable:$false] %s470_s16 }
  0x41   : > { %v217_v37 = vsub.s32 %v214_v25, %v216_v26  ;;  %p468_p11 = pnand %p467_p8, %p748_p9  ;;  %s472_s17 = scalar_lea.vmem %s471_s16, 128 }
  0x42   : > { %v183_v21 = vmax.f32 %v181_v10, %v182_v17  ;;  %v189_v22 = vrot.slane %v188_v18, 2  ;;  %v197_v23 = vmax.f32 %v195_v12, %v196_v19  ;;  %v203_v24 = vrot.slane %v202_v20, 2  ;;  %p473_p6 = scmp.lt.s32.totalorder %s687_s29, %s471_s16  ;;  %p474_p13 = scmp.lt.s32.totalorder %s472_s17, %s466_s15 }
  0x43   : > { %p469_p0 = pneg %p468_p11 }
  0x44   : > { %v184_v27 = vrot.slane %v183_v21, 1  ;;  %v190_v28 = vmax.f32 %v188_v18, %v189_v22  ;;  %v198_v29 = vrot.slane %v197_v23, 1  ;;  %v204_v30 = vmax.f32 %v202_v20, %v203_v24  ;;  %p475_p2 = por %p474_p13, %p473_p6 }
  0x46   : > { %v185_v31 = vmax.f32 %v183_v21, %v184_v27  ;;  %v191_v32 = vrot.slane %v190_v28, 1  ;;  %v199_v33 = vmax.f32 %v197_v23, %v198_v29  ;;  %v205_v34 = vrot.slane %v204_v30, 1  ;;  %p476_p5 = pnand %p475_p2, %p469_p0 }
  0x48   : > { %v192_v35 = vmax.f32 %v190_v28, %v191_v32  ;;  %v206_v36 = vmax.f32 %v204_v30, %v205_v34 }
  0x4a   : > { %v211_v38 = vcombine.low %v185_v31, %v192_v35  ;;  %v219_v39 = vcombine.low %v199_v33, %v206_v36 }
  0x4c   : > { %v218_v40 = vrot.slane %v211_v38, %v217_v37  ;;  %v226_v41 = vrot.slane %v219_v39, %v217_v37 }
  0x4e   : > { %v231_v42 = vrot.slane %v226_v41, 7 }
  0x50   : > { %v233_v43 = vsel %vm232_vm1, %v231_v42, %v218_v40 }
  0x51   : > { %v235_v44 = vsel %vm234_vm2, %v231_v42, %v233_v43 }
  0x52   : > { %v237_v45 = vsel %vm236_vm3, %v231_v42, %v235_v44 }
  0x53   : > { %v239_v46 = vsel %vm238_vm4, %v231_v42, %v237_v45 }
  0x54   : > { %241 = vst [vmem:[%s166_s27] sm:$0xf] %v239_v46 }
  0x55   : > { %479 = shalt.err (!%p476_p5)
}
  0x56   : > { %s480_s22 = scalar_lea.hbm %s692_s12, 64  ;;  %s484_s25 = scalar_lea.hbm %s740_s1, 128 }
  0x57   : > { %p481_p4 = scmp.ne.s32.totalorder %s692_s12, %s480_s22  ;;  %p485_p12 = scmp.lt.u32.totalorder %s692_s12, %s740_s1 }
  0x58   : > { %p486_p1 = scmp.lt.u32.totalorder %s484_s25, %s480_s22  ;;  %p488_p8 = scmp.lt.u32.totalorder %s480_s22, %s692_s12 }
  0x59   : > { %p482_p7 = pnand %p481_p4, %p748_p9 }
  0x5a   : > { %p487_p3 = por %p486_p1, %p485_p12 }
  0x5b   : > { %p483_p10 = pneg %p482_p7 }
  0x5c   : > { %p489_p11 = por %p488_p8, %p487_p3 }
  0x5e   : > { %p490_p0 = pnand %p489_p11, %p483_p10 }
  0x60   : > { %493 = shalt.err (!%p490_p0)
}
  0x61   : > { %371 = dma.vmem_to_hbm [thread:$0]  (%p748_p9), %s687_s29, 64, %s692_s12, %s243_s13  }
  0x62 PF: > { %s273_s3 = sand.u32 1, %s528_s6   ;;  %p749_p6 = scmp.ne.s32.totalorder %s745_s21, 0 }
  0x63   : > { %p750_p13 = scmp.ge.s32.totalorder %s548_s11, 2  ;;  %s274_s4 = scalar_lea.sflag [#allocation4], %s273_s3 }
  0x65   : > { %p378_p2 = pnand %p750_p13, %p749_p6 }
  0x67   : > { %523 = dma.done.wait (!%p378_p2), %s274_s4, 64  }
  0x68   : > { %525 = vsyncadd (!%p378_p2), %s274_s4, 4294967232  ;;  %s17_s11 = sadd.s32 1, %s548_s11   ;;  %s751_s6 = smov %s532_s7 }
  0x69   : > { %p14_p5 = scmp.ge.s32.totalorder %s17_s11, 4   ;;  %s752_s7 = smov %s536_s8 }
  0x6a   : > { %s753_s8 = smov %s621_s20  ;;  %s754_s9 = smov %s544_s10 }
  0x6b   : > { %s755_s10 = smov %s757_s14  ;;  %16 = sbr.rel (!%p14_p5) target bundleno = 6 (0x6), region = 69 }
  0x72   :  { %279 = vsyncpa [#allocation3], 1 }
  0x73   :  { %281 = vsyncpa [#allocation3 + $0x1], 1 }
  0x74   :  { %282 = vsyncpa [#allocation4], 1 }
  0x75   :  { %284 = vsyncpa [#allocation4 + $0x1], 1 }

</bundles_post_ra>
